<compile_context>
chip_gen: v7x
topology: tpu7x:2x2x1
jax: 0.10.0
libtpu: 0.0.40
codegen_flags: <defaults>
</compile_context>

<pallas_src>
import functools

import jax
import jax.numpy as jnp
from jax.experimental import pallas as pl
from jax.experimental.pallas import tpu as pltpu


# ----------------------------- small helpers --------------------------------
def _pair(v):
    if isinstance(v, (tuple, list)):
        assert len(v) == 2
        return tuple(v)
    return (v, v)


def _quadruple(v):
    if isinstance(v, (tuple, list)):
        assert len(v) == 4
        return tuple(v)
    return (v, v, v, v)


def _pick_batch_block(nc, bytes_per_slab, *, vmem_budget=8 * 1024 * 1024,
                      min_steps=2):
    """Number of (n, c) slabs per grid step.

    Big enough for MiB-sized DMAs, but small enough that the double-buffered
    input+output blocks stay around `vmem_budget` (conservative for v7x's
    64 MiB VMEM), and with >=2 grid steps when possible so the parallel grid
    axis can feed both v7x TensorCores / overlap DMA with compute.
    """
    tb = max(1, int(vmem_budget // (2 * bytes_per_slab)))
    tb = min(tb, nc)
    if nc >= min_steps:
        tb = min(tb, pl.cdiv(nc, min_steps))
    return max(tb, 1)


# ------------------------------ Pallas kernel --------------------------------
def _unfold_kernel(x_ref, o_ref, *, k0, k1, s0, s1, oh, ow):
    """x_ref: (TB, H_p, W_p) padded slabs; o_ref: (TB, k0, k1, oh, ow)."""

    def win(start, size, stride):
        # Strided ref window: decimation happens in the load itself rather
        # than a lane-strided lax.slice (which burns VPU/XLU slots).
        return pl.ds(start, size) if stride == 1 else pl.ds(start, size, stride)

    # k0, k1 are tiny static ints -> fully unrolled.  Each (i, j) streams one
    # (TB, oh, ow) window directly from the input ref into the output ref,
    # keeping the live vreg set small even for large batched blocks.
    for i in range(k0):
        for j in range(k1):
            o_ref[:, i, j, :, :] = x_ref[:, win(i, oh, s0), win(j, ow, s1)]


# ------------------------------ module wrapper -------------------------------
def attention_pool2d(x, kernel_size=3, stride=1, padding=0, same=False,
                     layout="torch"):
    """Forward pass of AttentionPool2d (reflect pad + unfold) on TPU.

    layout="torch"  -> (N, C, oh, ow, k0, k1), exactly like
                       x.unfold(2, k0, s0).unfold(3, k1, s1) in PyTorch.
                       NOTE: this pays one 9x-sized HBM read+write for the
                       final axis reorder outside the kernel.
    layout="native" -> (N, C, k0, k1, oh, ow), kernel-native order, no
                       post-kernel transpose (preferred when the consumer can
                       accept it, e.g. an immediately following reduction over
                       the patch axes).
    """
    k = _pair(kernel_size)
    st = _pair(stride)
    pad = _quadruple(padding)

    n, c, ih, iw = x.shape

    # Replicate AttentionPool2d._padding
    if same:
        if ih % st[0] == 0:
            ph = max(k[0] - st[0], 0)
        else:
            ph = max(k[0] - ih % st[0], 0)
        if iw % st[1] == 0:
            pw = max(k[1] - st[1], 0)
        else:
            pw = max(k[1] - iw % st[1], 0)
        p_l = pw // 2
        p_r = pw - p_l
        p_t = ph // 2
        p_b = ph - p_t
        pad = (p_l, p_r, p_t, p_b)

    p_l, p_r, p_t, p_b = pad
    # F.pad(x, (l, r, t, b), mode='reflect') pads W with (l, r), H with (t, b).
    x_pad = jnp.pad(
        x, ((0, 0), (0, 0), (p_t, p_b), (p_l, p_r)), mode="reflect"
    )

    hp = ih + p_t + p_b
    wp = iw + p_l + p_r
    oh = (hp - k[0]) // st[0] + 1
    ow = (wp - k[1]) // st[1] + 1
    kk = k[0] * k[1]

    # Flatten (N, C) into one grid axis and batch TB slabs per grid step.
    nc = n * c
    x_flat = x_pad.reshape(nc, hp, wp)

    itemsize = x.dtype.itemsize
    bytes_per_slab = (hp * wp + kk * oh * ow) * itemsize
    tb = _pick_batch_block(nc, bytes_per_slab)
    nc_pad = pl.cdiv(nc, tb) * tb
    if nc_pad != nc:
        # Pad the flattened batch axis so TB evenly divides it; the extra
        # slabs produce throw-away output that is sliced off below.
        x_flat = jnp.pad(x_flat, ((0, nc_pad - nc), (0, 0), (0, 0)))

    kernel = functools.partial(
        _unfold_kernel, k0=k[0], k1=k[1], s0=st[0], s1=st[1], oh=oh, ow=ow
    )

    bytes_accessed = int(nc_pad * bytes_per_slab)

    out_flat = pl.pallas_call(
        kernel,
        out_shape=jax.ShapeDtypeStruct((nc_pad, k[0], k[1], oh, ow), x.dtype),
        grid=(nc_pad // tb,),
        in_specs=[pl.BlockSpec((tb, hp, wp), lambda b: (b, 0, 0))],
        out_specs=pl.BlockSpec(
            (tb, k[0], k[1], oh, ow), lambda b: (b, 0, 0, 0, 0)
        ),
        compiler_params=pltpu.CompilerParams(
            dimension_semantics=("parallel",)
        ),
        cost_estimate=pl.CostEstimate(
            flops=0, transcendentals=0, bytes_accessed=bytes_accessed
        ),
    )(x_flat)

    out = out_flat[:nc].reshape(n, c, k[0], k[1], oh, ow)
    if layout == "native":
        return out
    # PyTorch unfold order: (N, C, oh, ow, k0, k1).  This transpose is the one
    # remaining non-kernel data movement (reads+writes the 9x-sized output).
    return jnp.transpose(out, (0, 1, 4, 5, 2, 3))


# ------------------------------ pure-JAX reference ---------------------------
def _reference(x, kernel_size=3, stride=1, padding=0, same=False):
    k = _pair(kernel_size)
    st = _pair(stride)
    pad = _quadruple(padding)
    n, c, ih, iw = x.shape
    if same:
        ph = max(k[0] - st[0], 0) if ih % st[0] == 0 else max(k[0] - ih % st[0], 0)
        pw = max(k[1] - st[1], 0) if iw % st[1] == 0 else max(k[1] - iw % st[1], 0)
        p_l, p_r = pw // 2, pw - pw // 2
        p_t, p_b = ph // 2, ph - ph // 2
        pad = (p_l, p_r, p_t, p_b)
    p_l, p_r, p_t, p_b = pad
    xp = jnp.pad(x, ((0, 0), (0, 0), (p_t, p_b), (p_l, p_r)), mode="reflect")
    hp, wp = xp.shape[2], xp.shape[3]
    oh = (hp - k[0]) // st[0] + 1
    ow = (wp - k[1]) // st[1] + 1
    rows = []
    for i in range(k[0]):
        cols = []
        for j in range(k[1]):
            cols.append(
                xp[:, :, i : i + (oh - 1) * st[0] + 1 : st[0],
                         j : j + (ow - 1) * st[1] + 1 : st[1]]
            )
        rows.append(jnp.stack(cols, axis=-1))
    return jnp.stack(rows, axis=-2)  # (N, C, oh, ow, k0, k1)


# ----------------------------------- main ------------------------------------
if __name__ == "__main__":
    key = jax.random.PRNGKey(0)
    x = jax.random.normal(key, (2, 4, 16, 16), dtype=jnp.float32)

    # Exercise the reflect-pad ("same") path with the default 3x3 kernel.
    out = attention_pool2d(x, kernel_size=3, stride=1, padding=0, same=True)
    out = jax.block_until_ready(out)
    ref = _reference(x, kernel_size=3, stride=1, padding=0, same=True)
    assert out.shape == (2, 4, 16, 16, 3, 3), out.shape
    assert jnp.allclose(out, ref, atol=1e-6, rtol=1e-6)

    # Kernel-native layout (no post-kernel transpose) — same values, reordered.
    out_native = jax.block_until_ready(
        attention_pool2d(x, kernel_size=3, stride=1, padding=0, same=True,
                         layout="native"))
    assert out_native.shape == (2, 4, 3, 3, 16, 16), out_native.shape
    assert jnp.allclose(
        jnp.transpose(out_native, (0, 1, 4, 5, 2, 3)), ref, atol=1e-6, rtol=1e-6
    )

    # Also check the default (no padding) configuration.
    out2 = jax.block_until_ready(attention_pool2d(x))
    ref2 = _reference(x)
    assert out2.shape == (2, 4, 14, 14, 3, 3), out2.shape
    assert jnp.allclose(out2, ref2, atol=1e-6, rtol=1e-6)

    print("KERNEL_OK")
</pallas_src>

<mosaic_0001>
module attributes {stable_mosaic.version = 11 : i64} {
  func.func @_unfold_kernel(%arg0: i32, %arg1: memref<4x18x18xf32, #tpu.memory_space<vmem>>, %arg2: memref<4x3x3x16x16xf32, #tpu.memory_space<vmem>>) attributes {dimension_semantics = [#tpu.dimension_semantics<parallel>], iteration_bounds = array<i64: 2>, scalar_prefetch = 0 : i64, scratch_operands = 0 : i64, tpu.core_type = #tpu.core_type<tc>, window_params = [{transform_indices = @transform_0, window_bounds = array<i64: 4, 18, 18>}, {transform_indices = @transform_1, window_bounds = array<i64: 4, 3, 3, 16, 16>}]} {
    %c0 = arith.constant 0 : index
    %c0_0 = arith.constant 0 : index
    %c0_1 = arith.constant 0 : index
    %0 = vector.load %arg1[%c0, %c0_0, %c0_1] : memref<4x18x18xf32, #tpu.memory_space<vmem>>, vector<4x16x16xf32>
    %c0_2 = arith.constant 0 : index
    %c0_3 = arith.constant 0 : index
    %c0_4 = arith.constant 0 : index
    %c0_5 = arith.constant 0 : index
    %c0_6 = arith.constant 0 : index
    %1 = vector.load %arg2[%c0_2, %c0_3, %c0_4, %c0_5, %c0_6] : memref<4x3x3x16x16xf32, #tpu.memory_space<vmem>>, vector<4x1x1x16x16xf32>
    %2 = vector.shape_cast %1 : vector<4x1x1x16x16xf32> to vector<4x16x16xf32>
    %3 = vector.shape_cast %0 : vector<4x16x16xf32> to vector<4x1x1x16x16xf32>
    tpu.vector_store %arg2[%c0_2, %c0_3, %c0_4, %c0_5, %c0_6], %3 {strides = array<i32>} : memref<4x3x3x16x16xf32, #tpu.memory_space<vmem>>, vector<4x1x1x16x16xf32>,
    %c0_7 = arith.constant 0 : index
    %c0_8 = arith.constant 0 : index
    %c1 = arith.constant 1 : index
    %4 = vector.load %arg1[%c0_7, %c0_8, %c1] : memref<4x18x18xf32, #tpu.memory_space<vmem>>, vector<4x16x16xf32>
    %c0_9 = arith.constant 0 : index
    %c0_10 = arith.constant 0 : index
    %c1_11 = arith.constant 1 : index
    %c0_12 = arith.constant 0 : index
    %c0_13 = arith.constant 0 : index
    %5 = vector.load %arg2[%c0_9, %c0_10, %c1_11, %c0_12, %c0_13] : memref<4x3x3x16x16xf32, #tpu.memory_space<vmem>>, vector<4x1x1x16x16xf32>
    %6 = vector.shape_cast %5 : vector<4x1x1x16x16xf32> to vector<4x16x16xf32>
    %7 = vector.shape_cast %4 : vector<4x16x16xf32> to vector<4x1x1x16x16xf32>
    tpu.vector_store %arg2[%c0_9, %c0_10, %c1_11, %c0_12, %c0_13], %7 {strides = array<i32>} : memref<4x3x3x16x16xf32, #tpu.memory_space<vmem>>, vector<4x1x1x16x16xf32>,
    %c0_14 = arith.constant 0 : index
    %c0_15 = arith.constant 0 : index
    %c2 = arith.constant 2 : index
    %8 = vector.load %arg1[%c0_14, %c0_15, %c2] : memref<4x18x18xf32, #tpu.memory_space<vmem>>, vector<4x16x16xf32>
    %c0_16 = arith.constant 0 : index
    %c0_17 = arith.constant 0 : index
    %c2_18 = arith.constant 2 : index
    %c0_19 = arith.constant 0 : index
    %c0_20 = arith.constant 0 : index
    %9 = vector.load %arg2[%c0_16, %c0_17, %c2_18, %c0_19, %c0_20] : memref<4x3x3x16x16xf32, #tpu.memory_space<vmem>>, vector<4x1x1x16x16xf32>
    %10 = vector.shape_cast %9 : vector<4x1x1x16x16xf32> to vector<4x16x16xf32>
    %11 = vector.shape_cast %8 : vector<4x16x16xf32> to vector<4x1x1x16x16xf32>
    tpu.vector_store %arg2[%c0_16, %c0_17, %c2_18, %c0_19, %c0_20], %11 {strides = array<i32>} : memref<4x3x3x16x16xf32, #tpu.memory_space<vmem>>, vector<4x1x1x16x16xf32>,
    %c0_21 = arith.constant 0 : index
    %c1_22 = arith.constant 1 : index
    %c0_23 = arith.constant 0 : index
    %12 = vector.load %arg1[%c0_21, %c1_22, %c0_23] : memref<4x18x18xf32, #tpu.memory_space<vmem>>, vector<4x16x16xf32>
    %c0_24 = arith.constant 0 : index
    %c1_25 = arith.constant 1 : index
    %c0_26 = arith.constant 0 : index
    %c0_27 = arith.constant 0 : index
    %c0_28 = arith.constant 0 : index
    %13 = vector.load %arg2[%c0_24, %c1_25, %c0_26, %c0_27, %c0_28] : memref<4x3x3x16x16xf32, #tpu.memory_space<vmem>>, vector<4x1x1x16x16xf32>
    %14 = vector.shape_cast %13 : vector<4x1x1x16x16xf32> to vector<4x16x16xf32>
    %15 = vector.shape_cast %12 : vector<4x16x16xf32> to vector<4x1x1x16x16xf32>
    tpu.vector_store %arg2[%c0_24, %c1_25, %c0_26, %c0_27, %c0_28], %15 {strides = array<i32>} : memref<4x3x3x16x16xf32, #tpu.memory_space<vmem>>, vector<4x1x1x16x16xf32>,
    %c0_29 = arith.constant 0 : index
    %c1_30 = arith.constant 1 : index
    %c1_31 = arith.constant 1 : index
    %16 = vector.load %arg1[%c0_29, %c1_30, %c1_31] : memref<4x18x18xf32, #tpu.memory_space<vmem>>, vector<4x16x16xf32>
    %c0_32 = arith.constant 0 : index
    %c1_33 = arith.constant 1 : index
    %c1_34 = arith.constant 1 : index
    %c0_35 = arith.constant 0 : index
    %c0_36 = arith.constant 0 : index
    %17 = vector.load %arg2[%c0_32, %c1_33, %c1_34, %c0_35, %c0_36] : memref<4x3x3x16x16xf32, #tpu.memory_space<vmem>>, vector<4x1x1x16x16xf32>
    %18 = vector.shape_cast %17 : vector<4x1x1x16x16xf32> to vector<4x16x16xf32>
    %19 = vector.shape_cast %16 : vector<4x16x16xf32> to vector<4x1x1x16x16xf32>
    tpu.vector_store %arg2[%c0_32, %c1_33, %c1_34, %c0_35, %c0_36], %19 {strides = array<i32>} : memref<4x3x3x16x16xf32, #tpu.memory_space<vmem>>, vector<4x1x1x16x16xf32>,
    %c0_37 = arith.constant 0 : index
    %c1_38 = arith.constant 1 : index
    %c2_39 = arith.constant 2 : index
    %20 = vector.load %arg1[%c0_37, %c1_38, %c2_39] : memref<4x18x18xf32, #tpu.memory_space<vmem>>, vector<4x16x16xf32>
    %c0_40 = arith.constant 0 : index
    %c1_41 = arith.constant 1 : index
    %c2_42 = arith.constant 2 : index
    %c0_43 = arith.constant 0 : index
    %c0_44 = arith.constant 0 : index
    %21 = vector.load %arg2[%c0_40, %c1_41, %c2_42, %c0_43, %c0_44] : memref<4x3x3x16x16xf32, #tpu.memory_space<vmem>>, vector<4x1x1x16x16xf32>
    %22 = vector.shape_cast %21 : vector<4x1x1x16x16xf32> to vector<4x16x16xf32>
    %23 = vector.shape_cast %20 : vector<4x16x16xf32> to vector<4x1x1x16x16xf32>
    tpu.vector_store %arg2[%c0_40, %c1_41, %c2_42, %c0_43, %c0_44], %23 {strides = array<i32>} : memref<4x3x3x16x16xf32, #tpu.memory_space<vmem>>, vector<4x1x1x16x16xf32>,
    %c0_45 = arith.constant 0 : index
    %c2_46 = arith.constant 2 : index
    %c0_47 = arith.constant 0 : index
    %24 = vector.load %arg1[%c0_45, %c2_46, %c0_47] : memref<4x18x18xf32, #tpu.memory_space<vmem>>, vector<4x16x16xf32>
    %c0_48 = arith.constant 0 : index
    %c2_49 = arith.constant 2 : index
    %c0_50 = arith.constant 0 : index
    %c0_51 = arith.constant 0 : index
    %c0_52 = arith.constant 0 : index
    %25 = vector.load %arg2[%c0_48, %c2_49, %c0_50, %c0_51, %c0_52] : memref<4x3x3x16x16xf32, #tpu.memory_space<vmem>>, vector<4x1x1x16x16xf32>
    %26 = vector.shape_cast %25 : vector<4x1x1x16x16xf32> to vector<4x16x16xf32>
    %27 = vector.shape_cast %24 : vector<4x16x16xf32> to vector<4x1x1x16x16xf32>
    tpu.vector_store %arg2[%c0_48, %c2_49, %c0_50, %c0_51, %c0_52], %27 {strides = array<i32>} : memref<4x3x3x16x16xf32, #tpu.memory_space<vmem>>, vector<4x1x1x16x16xf32>,
    %c0_53 = arith.constant 0 : index
    %c2_54 = arith.constant 2 : index
    %c1_55 = arith.constant 1 : index
    %28 = vector.load %arg1[%c0_53, %c2_54, %c1_55] : memref<4x18x18xf32, #tpu.memory_space<vmem>>, vector<4x16x16xf32>
    %c0_56 = arith.constant 0 : index
    %c2_57 = arith.constant 2 : index
    %c1_58 = arith.constant 1 : index
    %c0_59 = arith.constant 0 : index
    %c0_60 = arith.constant 0 : index
    %29 = vector.load %arg2[%c0_56, %c2_57, %c1_58, %c0_59, %c0_60] : memref<4x3x3x16x16xf32, #tpu.memory_space<vmem>>, vector<4x1x1x16x16xf32>
    %30 = vector.shape_cast %29 : vector<4x1x1x16x16xf32> to vector<4x16x16xf32>
    %31 = vector.shape_cast %28 : vector<4x16x16xf32> to vector<4x1x1x16x16xf32>
    tpu.vector_store %arg2[%c0_56, %c2_57, %c1_58, %c0_59, %c0_60], %31 {strides = array<i32>} : memref<4x3x3x16x16xf32, #tpu.memory_space<vmem>>, vector<4x1x1x16x16xf32>,
    %c0_61 = arith.constant 0 : index
    %c2_62 = arith.constant 2 : index
    %c2_63 = arith.constant 2 : index
    %32 = vector.load %arg1[%c0_61, %c2_62, %c2_63] : memref<4x18x18xf32, #tpu.memory_space<vmem>>, vector<4x16x16xf32>
    %c0_64 = arith.constant 0 : index
    %c2_65 = arith.constant 2 : index
    %c2_66 = arith.constant 2 : index
    %c0_67 = arith.constant 0 : index
    %c0_68 = arith.constant 0 : index
    %33 = vector.load %arg2[%c0_64, %c2_65, %c2_66, %c0_67, %c0_68] : memref<4x3x3x16x16xf32, #tpu.memory_space<vmem>>, vector<4x1x1x16x16xf32>
    %34 = vector.shape_cast %33 : vector<4x1x1x16x16xf32> to vector<4x16x16xf32>
    %35 = vector.shape_cast %32 : vector<4x16x16xf32> to vector<4x1x1x16x16xf32>
    tpu.vector_store %arg2[%c0_64, %c2_65, %c2_66, %c0_67, %c0_68], %35 {strides = array<i32>} : memref<4x3x3x16x16xf32, #tpu.memory_space<vmem>>, vector<4x1x1x16x16xf32>,
    return
  }
  func.func @transform_0(%arg0: i32) -> (i32, i32, i32) {
    %c0_i32 = arith.constant 0 : i32
    %c0_i32_0 = arith.constant 0 : i32
    %c0_i32_1 = arith.constant 0 : i32
    return %arg0, %c0_i32, %c0_i32_0 : i32, i32, i32
  }
  func.func @transform_1(%arg0: i32) -> (i32, i32, i32, i32, i32) {
    %c0_i32 = arith.constant 0 : i32
    %c0_i32_0 = arith.constant 0 : i32
    %c0_i32_1 = arith.constant 0 : i32
    %c0_i32_2 = arith.constant 0 : i32
    %c0_i32_3 = arith.constant 0 : i32
    return %arg0, %c0_i32, %c0_i32_0, %c0_i32_1, %c0_i32_2 : i32, i32, i32, i32, i32
  }
}

</mosaic_0001>

<bundles_post_ra>
// kernel: tpu_custom_call.1
= control target key start
LH: loop header
LB: loop body
LE: loop exit
PB: predicated region body
PF: predicated region fallthrough
CT: control target
= control target key end

     0   :  { %6 = vsyncpa [#allocation3], 0  ;;  %s1070_s0 = inlined_call_operand.vmem [shape: f32[8,18,18], index: 0, kind: input, shape index: {}]   ;;  %s1071_s1 = inlined_call_operand.hbm [shape: f32[8,3,3,16,16], index: 1, kind: output, shape index: {}]  }
   0x1   :  { %8 = vsyncpa [#allocation3 + $0x1], 0  ;;  %s743_s6 = smov 0   ;;  %s745_s7 = smov 0  }
   0x2   :  { %s747_s8 = smov 0   ;;  %s749_s9 = smov 0  }
   0x3 LB: > { %s764_s10 = sadd.s32 4294967295, %s726_s9   ;;  %s543_s11 = sadd.s32 4294967294, %s726_s9   ;;  %s726_s9 = sphi %s749_s9, %s1077_s9   ;;  %s722_s8 = sphi %s747_s8, %s1076_s8   ;;  %s718_s7 = sphi %s745_s7, %s1075_s7   ;;  %s714_s6 = sphi %s743_s6, %s1074_s6  }
   0x4   : > { %s768_s12 = sadd.s32 1, %s726_s9   ;;  %s47_s13 = sadd.s32 1, %s722_s8 }
   0x5   : > { %s44_s14 = ssub.s32 %s726_s9, %s768_s12  ;;  %p57_p0 = scmp.ne.s32.totalorder %s722_s8, %s718_s7 }
   0x6   : > { %p45_p1 = scmp.eq.s32.totalorder %s44_s14, 0  ;;  %p58_p2 = scmp.eq.s32.totalorder %s764_s10, 1 }
   0x7   : > { %p63_p3 = scmp.ne.s32.totalorder %s718_s7, %s714_s6  ;;  %p64_p4 = scmp.eq.s32.totalorder %s543_s11, 1 }
   0x8   : > { %s779_s15 = scalar_select %p45_p1, %s722_s8, %s47_s13  }
   0x9   : > { %p781_p5 = por %p58_p2, %p57_p0  ;;  %p785_p6 = por %p64_p4, %p63_p3 }
   0xa   : > { %p546_p7 = scmp.ge.s32.totalorder %s726_s9, 1  ;;  %p92_p8 = scmp.lt.s32.totalorder %s726_s9, 3 }
   0xc   : > { %p93_p9 = pnand %p546_p7, %p92_p8 }
   0xd   : > { %s547_s18 = sshll.u32 (!%p93_p9), %s764_s10, 2  ;;  %s110_s19 = sand.u32 (!%p93_p9), 1, %s718_s7   ;;  %vm129_vm0 = vcmask (!%p93_p9), 130048  }
   0xe   : > { %96 = sbr.rel (%p93_p9) target bundleno = 251 (0xfb), region = 24  ;;  %p114_p10 = scmp.lt.s32.totalorder (!%p93_p9), %s547_s18, 7 }
   0xf   : > { %s618_s20 = smul.u32 (!%p93_p9), 576, %s110_s19  ;;  %s728_s25 = smov (!%p93_p9), 127  }
  0x10   : > { %s729_s27 = smov (!%p93_p9), 126   ;;  %s620_s28 = smul.u32 (!%p93_p9), 9216, %s764_s10 }
  0x11   : > { %s807_s26 = scalar_lea.vmem (!%p93_p9), [#allocation2], %s618_s20  ;;  %s1029_s4 = scalar_lea.sflag (!%p93_p9), [#allocation3], %s110_s19 }
  0x12   : > { %s481_s29 = sshll.u32 (!%p93_p9), %s807_s26, 4  ;;  %s1019_s3 = scalar_lea.hbm (!%p93_p9), %s1071_s1, %s620_s28  ;;  %s1021_s29 = int_to_ptr.vmem [resolvable:$true] %s481_s29 }
  0x13   : > { %s664_s5 = scalar_lea.vmem (!%p93_p9), %s1021_s29, 9216  ;;  %s730_s10 = smov (!%p93_p9), [#allocation2]  }
  0x14   : > { %p665_p11 = scmp.ne.s32.totalorder (!%p93_p9), %s1021_s29, %s664_s5  ;;  %s668_s11 = sshll.u32 (!%p93_p9), %s730_s10, 4  ;;  %s669_s11 = int_to_ptr.vmem [resolvable:$false] %s668_s11 }
  0x15   : > { %s1079_s18 = smov (!%p114_p10, %s547_s18), 7  ;;  %s670_s13 = scalar_lea.vmem %s669_s11, 18432 }
  0x16   : > { %s619_s21 = smul.u32 24, %s1079_s18  ;;  %p666_p12 = pnand %p665_p11, %p781_p5 }
  0x17   : > { %p671_p0 = scmp.lt.s32.totalorder %s1021_s29, %s669_s11  ;;  %p672_p1 = scmp.lt.s32.totalorder %s670_s13, %s664_s5 }
  0x18   : > { %s798_s24 = scalar_lea.vmem %s1070_s0, %s619_s21  ;;  %p667_p13 = pneg %p666_p12 }
  0x19   : > { %v140_v0 = vld [vmem:[%s798_s24 + $0x18] sm:$0xff]  ;;  %v138_v1 = vld [vmem:[%s798_s24] sm:$0xff]  ;;  %v139_v3 = vld [vmem:[%s798_s24 + $0x8] sm:$0xff]  ;;  %p673_p2 = por %p672_p1, %p671_p0 }
  0x1a   : > { %v141_v2 = vld [vmem:[%s798_s24 + $0x20] sm:$0xff]  ;;  %158 = vrot.lane.b32.xlu1 %v140_v0, %s728_s25  ;;  %154 = vrot.lane.b32.xlu0 %v138_v1, %s728_s25  ;;  %v143_v4 = vld [vmem:[%s798_s24 + $0x38] sm:$0xff] }
  0x1b   : > { %130 = vst.msk [vmem:[%s807_s26] sm:$0xff] %vm129_vm0, %v138_v1  ;;  %132 = vst.msk [vmem:[%s807_s26 + $0x90] sm:$0xff] %vm129_vm0, %v140_v0  ;;  %v142_v5 = vld [vmem:[%s798_s24 + $0x30] sm:$0xff]  ;;  %v144_v7 = vld [vmem:[%s798_s24 + $0x48] sm:$0xff]  ;;  %p674_p3 = pnand %p673_p2, %p667_p13 }
  0x1c   : > { %133 = vst.msk [vmem:[%s807_s26 + $0x98] sm:$0xff] %vm129_vm0, %v141_v2  ;;  %v145_v6 = vld [vmem:[%s798_s24 + $0x50] sm:$0xff]  ;;  %131 = vst.msk [vmem:[%s807_s26 + $0x8] sm:$0xff] %vm129_vm0, %v139_v3  ;;  %v253_v9 = vld [vmem:[%s798_s24 + $0x1] sm:$0xff] }
  0x1d   : > { %135 = vst.msk [vmem:[%s807_s26 + $0x128] sm:$0xff] %vm129_vm0, %v143_v4  ;;  %v254_v8 = vld [vmem:[%s798_s24 + $0x9] sm:$0xff]  ;;  %v256_v10 = vld [vmem:[%s798_s24 + $0x21] sm:$0xff]  ;;  %134 = vst.msk [vmem:[%s807_s26 + $0x120] sm:$0xff] %vm129_vm0, %v142_v5 }
  0x1e   : > { %136 = vst.msk [vmem:[%s807_s26 + $0x1b0] sm:$0xff] %vm129_vm0, %v144_v7  ;;  %137 = vst.msk [vmem:[%s807_s26 + $0x1b8] sm:$0xff] %vm129_vm0, %v145_v6  ;;  %v255_v11 = vld [vmem:[%s798_s24 + $0x19] sm:$0xff]  ;;  %v257_v13 = vld [vmem:[%s798_s24 + $0x31] sm:$0xff] }
  0x1f   : > { %v258_v12 = vld [vmem:[%s798_s24 + $0x39] sm:$0xff]  ;;  %565 = vst.msk [vmem:[%s807_s26 + $0x30] sm:$0xff] %vm129_vm0, %v253_v9  ;;  %566 = vst.msk [vmem:[%s807_s26 + $0x38] sm:$0xff] %vm129_vm0, %v254_v8  ;;  %160 = vrot.lane.b32.xlu1 %v141_v2, %s728_s25 }
  0x20   : > { %568 = vst.msk [vmem:[%s807_s26 + $0xc8] sm:$0xff] %vm129_vm0, %v256_v10  ;;  %156 = vrot.lane.b32.xlu0 %v139_v3, %s728_s25  ;;  %v260_v14 = vld [vmem:[%s798_s24 + $0x51] sm:$0xff]  ;;  %v259_v15 = vld [vmem:[%s798_s24 + $0x49] sm:$0xff] }
  0x21   : > { %567 = vst.msk [vmem:[%s807_s26 + $0xc0] sm:$0xff] %vm129_vm0, %v255_v11  ;;  %569 = vst.msk [vmem:[%s807_s26 + $0x150] sm:$0xff] %vm129_vm0, %v257_v13  ;;  %v369_v16 = vld [vmem:[%s798_s24 + $0xa] sm:$0xff]  ;;  %v368_v17 = vld [vmem:[%s798_s24 + $0x2] sm:$0xff] }
  0x22   : > { %570 = vst.msk [vmem:[%s807_s26 + $0x158] sm:$0xff] %vm129_vm0, %v258_v12  ;;  %v371_v18 = vld [vmem:[%s798_s24 + $0x22] sm:$0xff]  ;;  %571 = vst.msk [vmem:[%s807_s26 + $0x1e0] sm:$0xff] %vm129_vm0, %v259_v15  ;;  %v370_v19 = vld [vmem:[%s798_s24 + $0x1a] sm:$0xff] }
  0x23   : > { %572 = vst.msk [vmem:[%s807_s26 + $0x1e8] sm:$0xff] %vm129_vm0, %v260_v14  ;;  %v373_v20 = vld [vmem:[%s798_s24 + $0x3a] sm:$0xff]  ;;  %v372_v21 = vld [vmem:[%s798_s24 + $0x32] sm:$0xff]  ;;  %589 = vst.msk [vmem:[%s807_s26 + $0x60] sm:$0xff] %vm129_vm0, %v368_v17 }
  0x24   : > { %590 = vst.msk [vmem:[%s807_s26 + $0x68] sm:$0xff] %vm129_vm0, %v369_v16  ;;  %592 = vst.msk [vmem:[%s807_s26 + $0xf8] sm:$0xff] %vm129_vm0, %v371_v18  ;;  %v375_v22 = vld [vmem:[%s798_s24 + $0x52] sm:$0xff]  ;;  %v374_v23 = vld [vmem:[%s798_s24 + $0x4a] sm:$0xff] }
  0x25   : > { %591 = vst.msk [vmem:[%s807_s26 + $0xf0] sm:$0xff] %vm129_vm0, %v370_v19  ;;  %593 = vst.msk [vmem:[%s807_s26 + $0x180] sm:$0xff] %vm129_vm0, %v372_v21  ;;  %164 = vrot.lane.b32.xlu1 %v143_v4, %s728_s25  ;;  %162 = vrot.lane.b32.xlu0 %v142_v5, %s728_s25 }
  0x26   : > { %594 = vst.msk [vmem:[%s807_s26 + $0x188] sm:$0xff] %vm129_vm0, %v373_v20  ;;  %595 = vst.msk [vmem:[%s807_s26 + $0x210] sm:$0xff] %vm129_vm0, %v374_v23 }
  0x27   : > { %596 = vst.msk [vmem:[%s807_s26 + $0x218] sm:$0xff] %vm129_vm0, %v375_v22 }
  0x29   : > { %168 = vrot.lane.b32.xlu1 %v145_v6, %s728_s25  ;;  %166 = vrot.lane.b32.xlu0 %v144_v7, %s728_s25 }
  0x2d   : > { %205 = vrot.lane.b32.xlu1 %v139_v3, %s729_s27  ;;  %203 = vrot.lane.b32.xlu0 %v138_v1, %s729_s27 }
  0x31   : > { %209 = vrot.lane.b32.xlu1 %v141_v2, %s729_s27  ;;  %207 = vrot.lane.b32.xlu0 %v140_v0, %s729_s27 }
  0x35   : > { %213 = vrot.lane.b32.xlu1 %v143_v4, %s729_s27  ;;  %211 = vrot.lane.b32.xlu0 %v142_v5, %s729_s27 }
  0x39   : > { %217 = vrot.lane.b32.xlu1 %v145_v6, %s729_s27  ;;  %215 = vrot.lane.b32.xlu0 %v144_v7, %s729_s27 }
  0x3d   : > { %271 = vrot.lane.b32.xlu1 %v254_v8, %s728_s25  ;;  %269 = vrot.lane.b32.xlu0 %v253_v9, %s728_s25 }
  0x41   : > { %275 = vrot.lane.b32.xlu1 %v256_v10, %s728_s25  ;;  %273 = vrot.lane.b32.xlu0 %v255_v11, %s728_s25 }
  0x45   : > { %279 = vrot.lane.b32.xlu1 %v258_v12, %s728_s25  ;;  %277 = vrot.lane.b32.xlu0 %v257_v13, %s728_s25 }
  0x49   : > { %283 = vrot.lane.b32.xlu1 %v260_v14, %s728_s25  ;;  %281 = vrot.lane.b32.xlu0 %v259_v15, %s728_s25 }
  0x4d   : > { %320 = vrot.lane.b32.xlu1 %v254_v8, %s729_s27  ;;  %318 = vrot.lane.b32.xlu0 %v253_v9, %s729_s27 }
  0x51   : > { %324 = vrot.lane.b32.xlu1 %v256_v10, %s729_s27  ;;  %322 = vrot.lane.b32.xlu0 %v255_v11, %s729_s27 }
  0x55   : > { %328 = vrot.lane.b32.xlu1 %v258_v12, %s729_s27  ;;  %326 = vrot.lane.b32.xlu0 %v257_v13, %s729_s27 }
  0x59   : > { %332 = vrot.lane.b32.xlu1 %v260_v14, %s729_s27  ;;  %330 = vrot.lane.b32.xlu0 %v259_v15, %s729_s27 }
  0x5d   : > { %386 = vrot.lane.b32.xlu1 %v369_v16, %s728_s25  ;;  %384 = vrot.lane.b32.xlu0 %v368_v17, %s728_s25 }
  0x61   : > { %390 = vrot.lane.b32.xlu1 %v371_v18, %s728_s25  ;;  %388 = vrot.lane.b32.xlu0 %v370_v19, %s728_s25 }
  0x65   : > { %394 = vrot.lane.b32.xlu1 %v373_v20, %s728_s25  ;;  %392 = vrot.lane.b32.xlu0 %v372_v21, %s728_s25 }
  0x69   : > { %398 = vrot.lane.b32.xlu1 %v375_v22, %s728_s25  ;;  %396 = vrot.lane.b32.xlu0 %v374_v23, %s728_s25 }
  0x6d   : > { %435 = vrot.lane.b32.xlu1 %v369_v16, %s729_s27  ;;  %433 = vrot.lane.b32.xlu0 %v368_v17, %s729_s27 }
  0x71   : > { %439 = vrot.lane.b32.xlu1 %v371_v18, %s729_s27  ;;  %437 = vrot.lane.b32.xlu0 %v370_v19, %s729_s27 }
  0x75   : > { %443 = vrot.lane.b32.xlu1 %v373_v20, %s729_s27  ;;  %441 = vrot.lane.b32.xlu0 %v372_v21, %s729_s27 }
  0x79   : > { %447 = vrot.lane.b32.xlu1 %v375_v22, %s729_s27  ;;  %445 = vrot.lane.b32.xlu0 %v374_v23, %s729_s27 }
  0x8c   : > { %v159_v24 = vpop.permute.xlu1 %158  ;;  %v155_v25 = vpop.permute.xlu0 %154 }
  0x8d   : > { %551 = vst.msk [vmem:[%s807_s26 + $0xa0] sm:$0xff] %vm129_vm0, %v159_v24  ;;  %549 = vst.msk [vmem:[%s807_s26 + $0x10] sm:$0xff] %vm129_vm0, %v155_v25 }
  0x91   : > { %v161_v26 = vpop.permute.xlu1 %160 }
  0x92   : > { %v157_v27 = vpop.permute.xlu0 %156  ;;  %552 = vst.msk [vmem:[%s807_s26 + $0xa8] sm:$0xff] %vm129_vm0, %v161_v26 }
  0x93   : > { %550 = vst.msk [vmem:[%s807_s26 + $0x18] sm:$0xff] %vm129_vm0, %v157_v27 }
  0x97   : > { %v165_v28 = vpop.permute.xlu1 %164  ;;  %v163_v29 = vpop.permute.xlu0 %162 }
  0x98   : > { %554 = vst.msk [vmem:[%s807_s26 + $0x138] sm:$0xff] %vm129_vm0, %v165_v28  ;;  %553 = vst.msk [vmem:[%s807_s26 + $0x130] sm:$0xff] %vm129_vm0, %v163_v29 }
  0x9b   : > { %v169_v30 = vpop.permute.xlu1 %168  ;;  %v167_v31 = vpop.permute.xlu0 %166 }
  0x9c   : > { %556 = vst.msk [vmem:[%s807_s26 + $0x1c8] sm:$0xff] %vm129_vm0, %v169_v30  ;;  %555 = vst.msk [vmem:[%s807_s26 + $0x1c0] sm:$0xff] %vm129_vm0, %v167_v31 }
  0x9f   : > { %v206_v32 = vpop.permute.xlu1 %205  ;;  %v204_v33 = vpop.permute.xlu0 %203 }
  0xa0   : > { %558 = vst.msk [vmem:[%s807_s26 + $0x28] sm:$0xff] %vm129_vm0, %v206_v32  ;;  %557 = vst.msk [vmem:[%s807_s26 + $0x20] sm:$0xff] %vm129_vm0, %v204_v33 }
  0xa3   : > { %v210_v34 = vpop.permute.xlu1 %209  ;;  %v208_v35 = vpop.permute.xlu0 %207 }
  0xa4   : > { %560 = vst.msk [vmem:[%s807_s26 + $0xb8] sm:$0xff] %vm129_vm0, %v210_v34  ;;  %559 = vst.msk [vmem:[%s807_s26 + $0xb0] sm:$0xff] %vm129_vm0, %v208_v35 }
  0xa7   : > { %v214_v36 = vpop.permute.xlu1 %213  ;;  %v212_v37 = vpop.permute.xlu0 %211 }
  0xa8   : > { %562 = vst.msk [vmem:[%s807_s26 + $0x148] sm:$0xff] %vm129_vm0, %v214_v36  ;;  %561 = vst.msk [vmem:[%s807_s26 + $0x140] sm:$0xff] %vm129_vm0, %v212_v37 }
  0xab   : > { %v218_v38 = vpop.permute.xlu1 %217  ;;  %v216_v39 = vpop.permute.xlu0 %215 }
  0xac   : > { %564 = vst.msk [vmem:[%s807_s26 + $0x1d8] sm:$0xff] %vm129_vm0, %v218_v38  ;;  %563 = vst.msk [vmem:[%s807_s26 + $0x1d0] sm:$0xff] %vm129_vm0, %v216_v39 }
  0xaf   : > { %v272_v40 = vpop.permute.xlu1 %271  ;;  %v270_v41 = vpop.permute.xlu0 %269 }
  0xb0   : > { %574 = vst.msk [vmem:[%s807_s26 + $0x48] sm:$0xff] %vm129_vm0, %v272_v40  ;;  %573 = vst.msk [vmem:[%s807_s26 + $0x40] sm:$0xff] %vm129_vm0, %v270_v41 }
  0xb3   : > { %v276_v42 = vpop.permute.xlu1 %275  ;;  %v274_v43 = vpop.permute.xlu0 %273 }
  0xb4   : > { %576 = vst.msk [vmem:[%s807_s26 + $0xd8] sm:$0xff] %vm129_vm0, %v276_v42  ;;  %575 = vst.msk [vmem:[%s807_s26 + $0xd0] sm:$0xff] %vm129_vm0, %v274_v43 }
  0xb7   : > { %v280_v44 = vpop.permute.xlu1 %279  ;;  %v278_v45 = vpop.permute.xlu0 %277 }
  0xb8   : > { %578 = vst.msk [vmem:[%s807_s26 + $0x168] sm:$0xff] %vm129_vm0, %v280_v44  ;;  %577 = vst.msk [vmem:[%s807_s26 + $0x160] sm:$0xff] %vm129_vm0, %v278_v45 }
  0xbb   : > { %v284_v46 = vpop.permute.xlu1 %283  ;;  %v282_v47 = vpop.permute.xlu0 %281 }
  0xbc   : > { %580 = vst.msk [vmem:[%s807_s26 + $0x1f8] sm:$0xff] %vm129_vm0, %v284_v46  ;;  %579 = vst.msk [vmem:[%s807_s26 + $0x1f0] sm:$0xff] %vm129_vm0, %v282_v47 }
  0xbf   : > { %v321_v48 = vpop.permute.xlu1 %320  ;;  %v319_v49 = vpop.permute.xlu0 %318 }
  0xc0   : > { %582 = vst.msk [vmem:[%s807_s26 + $0x58] sm:$0xff] %vm129_vm0, %v321_v48  ;;  %581 = vst.msk [vmem:[%s807_s26 + $0x50] sm:$0xff] %vm129_vm0, %v319_v49 }
  0xc3   : > { %v325_v50 = vpop.permute.xlu1 %324  ;;  %v323_v51 = vpop.permute.xlu0 %322 }
  0xc4   : > { %584 = vst.msk [vmem:[%s807_s26 + $0xe8] sm:$0xff] %vm129_vm0, %v325_v50  ;;  %583 = vst.msk [vmem:[%s807_s26 + $0xe0] sm:$0xff] %vm129_vm0, %v323_v51 }
  0xc7   : > { %v329_v52 = vpop.permute.xlu1 %328  ;;  %v327_v53 = vpop.permute.xlu0 %326 }
  0xc8   : > { %586 = vst.msk [vmem:[%s807_s26 + $0x178] sm:$0xff] %vm129_vm0, %v329_v52  ;;  %585 = vst.msk [vmem:[%s807_s26 + $0x170] sm:$0xff] %vm129_vm0, %v327_v53 }
  0xcb   : > { %v333_v54 = vpop.permute.xlu1 %332  ;;  %v331_v55 = vpop.permute.xlu0 %330 }
  0xcc   : > { %588 = vst.msk [vmem:[%s807_s26 + $0x208] sm:$0xff] %vm129_vm0, %v333_v54  ;;  %587 = vst.msk [vmem:[%s807_s26 + $0x200] sm:$0xff] %vm129_vm0, %v331_v55 }
  0xcf   : > { %v387_v56 = vpop.permute.xlu1 %386  ;;  %v385_v57 = vpop.permute.xlu0 %384 }
  0xd0   : > { %598 = vst.msk [vmem:[%s807_s26 + $0x78] sm:$0xff] %vm129_vm0, %v387_v56  ;;  %597 = vst.msk [vmem:[%s807_s26 + $0x70] sm:$0xff] %vm129_vm0, %v385_v57 }
  0xd3   : > { %v391_v58 = vpop.permute.xlu1 %390  ;;  %v389_v59 = vpop.permute.xlu0 %388 }
  0xd4   : > { %600 = vst.msk [vmem:[%s807_s26 + $0x108] sm:$0xff] %vm129_vm0, %v391_v58  ;;  %599 = vst.msk [vmem:[%s807_s26 + $0x100] sm:$0xff] %vm129_vm0, %v389_v59 }
  0xd7   : > { %v395_v60 = vpop.permute.xlu1 %394  ;;  %v393_v61 = vpop.permute.xlu0 %392 }
  0xd8   : > { %602 = vst.msk [vmem:[%s807_s26 + $0x198] sm:$0xff] %vm129_vm0, %v395_v60  ;;  %601 = vst.msk [vmem:[%s807_s26 + $0x190] sm:$0xff] %vm129_vm0, %v393_v61 }
  0xdb   : > { %v399_v62 = vpop.permute.xlu1 %398  ;;  %v397_v63 = vpop.permute.xlu0 %396 }
  0xdc   : > { %604 = vst.msk [vmem:[%s807_s26 + $0x228] sm:$0xff] %vm129_vm0, %v399_v62  ;;  %603 = vst.msk [vmem:[%s807_s26 + $0x220] sm:$0xff] %vm129_vm0, %v397_v63 }
  0xdf   : > { %v436_v0 = vpop.permute.xlu1 %435  ;;  %v434_v1 = vpop.permute.xlu0 %433 }
  0xe0   : > { %606 = vst.msk [vmem:[%s807_s26 + $0x88] sm:$0xff] %vm129_vm0, %v436_v0  ;;  %605 = vst.msk [vmem:[%s807_s26 + $0x80] sm:$0xff] %vm129_vm0, %v434_v1 }
  0xe3   : > { %v440_v2 = vpop.permute.xlu1 %439  ;;  %v438_v3 = vpop.permute.xlu0 %437 }
  0xe4   : > { %608 = vst.msk [vmem:[%s807_s26 + $0x118] sm:$0xff] %vm129_vm0, %v440_v2  ;;  %607 = vst.msk [vmem:[%s807_s26 + $0x110] sm:$0xff] %vm129_vm0, %v438_v3 }
  0xe7   : > { %v444_v4 = vpop.permute.xlu1 %443  ;;  %v442_v5 = vpop.permute.xlu0 %441 }
  0xe8   : > { %610 = vst.msk [vmem:[%s807_s26 + $0x1a8] sm:$0xff] %vm129_vm0, %v444_v4  ;;  %609 = vst.msk [vmem:[%s807_s26 + $0x1a0] sm:$0xff] %vm129_vm0, %v442_v5 }
  0xeb   : > { %v448_v6 = vpop.permute.xlu1 %447  ;;  %v446_v7 = vpop.permute.xlu0 %445 }
  0xec   : > { %612 = vst.msk [vmem:[%s807_s26 + $0x238] sm:$0xff] %vm129_vm0, %v448_v6  ;;  %611 = vst.msk [vmem:[%s807_s26 + $0x230] sm:$0xff] %vm129_vm0, %v446_v7 }
  0xed   : > { %677 = shalt.err (!%p674_p3)
}
  0xee   : > { %s678_s14 = scalar_lea.hbm %s1019_s3, 9216  ;;  %s682_s20 = scalar_lea.hbm %s1071_s1, 18432 }
  0xef   : > { %p679_p4 = scmp.ne.s32.totalorder %s1019_s3, %s678_s14  ;;  %p683_p9 = scmp.lt.u32.totalorder %s1019_s3, %s1071_s1 }
  0xf0   : > { %p684_p10 = scmp.lt.u32.totalorder %s682_s20, %s678_s14  ;;  %p686_p12 = scmp.lt.u32.totalorder %s678_s14, %s1019_s3 }
  0xf1   : > { %p680_p7 = pnand %p679_p4, %p781_p5 }
  0xf2   : > { %p685_p11 = por %p684_p10, %p683_p9 }
  0xf3   : > { %p681_p8 = pneg %p680_p7 }
  0xf4   : > { %p687_p13 = por %p686_p12, %p685_p11 }
  0xf6   : > { %p688_p0 = pnand %p687_p13, %p681_p8 }
  0xf8   : > { %691 = shalt.err (!%p688_p0)
}
  0xf9   : > { %s731_s23 = smov 128   ;;  %s732_s24 = smov 8  }
  0xfa   : > { %621 = dma.vmem_to_hbm [thread:$0]  (%p781_p5), %s1021_s29, 9216, %s1019_s3, %s1029_s4, %s731_s23, %s731_s23, %s732_s24  }
  0xfb PF: > { %p627_p1 = scmp.ge.s32.totalorder %s726_s9, 2  ;;  %s496_s25 = sand.u32 1, %s714_s6  }
  0xfc   : > { %s497_s26 = scalar_lea.sflag [#allocation3], %s496_s25 }
  0xfd   : > { %p624_p2 = pnand %p627_p1, %p785_p6 }
  0xff   : > { %709 = dma.done.wait (!%p624_p2), %s497_s26, 9216  }
 0x100   : > { %711 = vsyncadd (!%p624_p2), %s497_s26, 4294958080  ;;  %p11_p3 = scmp.ge.s32.totalorder %s768_s12, 4   ;;  %s1074_s6 = smov %s718_s7 }
 0x101   : > { %s1075_s7 = smov %s722_s8  ;;  %s1076_s8 = smov %s779_s15 }
 0x102   : > { %s1077_s9 = smov %s768_s12  ;;  %13 = sbr.rel (!%p11_p3) target bundleno = 3 (0x3), region = 67 }
 0x109   :  { %502 = vsyncpa [#allocation3], 1 }
 0x10a   :  { %504 = vsyncpa [#allocation3 + $0x1], 1 }

</bundles_post_ra>
